<compile_context>
chip_gen: v6e
topology: v6e:2x2x1
jax: 0.10.0
libtpu: 0.0.40
codegen_flags: <defaults>
</compile_context>

<pallas_src>
import functools

import jax
import jax.numpy as jnp
from jax.experimental import pallas as pl
from jax.experimental.pallas import tpu as pltpu


def _round_up(x, m):
    return ((x + m - 1) // m) * m


def _default_max_tile_m():
    # Generation-sized row tiles (per review): v5e <= 8192 (16 MiB default scoped VMEM,
    # ~0.8 TB/s HBM), v6e 8192-16384 (~1.4 TB/s), v7x 16384 (3.2 TB/s, 64 MiB VMEM).
    try:
        kind = jax.devices()[0].device_kind.lower()
    except Exception:
        return 8192
    if "v5 lite" in kind or "v5e" in kind or "v5lite" in kind:
        return 8192
    if "7" in kind:
        return 16384
    return 8192


# ---------------------------------------------------------------------------
# Fused kernel (transposed / lane-dense layout): rows of the node-feature matrix
# live on the 128-lane axis, so every store is a full-lane vst and the class-dim
# softmax reductions run over a handful of sublanes of fully-populated vregs.
#   y^T      = leaky_relu([W_nsi^T ; W_ff^T] @ x^T + [b_nsi ; b_ff])   (d_hidden, tile_m)
#   logits^T = class_proto @ node_state^T                              (nclass,  tile_m)
#   out      = [ y^T ; log_softmax(logits^T, axis=0) ]                 (d_out,   tile_m)
# ---------------------------------------------------------------------------
def _n2_fused_kernel(xT_ref, w_ref, b_ref, proto_ref, out_ref, *,
                     d_hidden, q_dim, nclass):
    xT = xT_ref[...]                                                    # (d_in, tile_m)

    # Both linear layers as ONE MXU matmul (concatenated weights).
    y = jnp.dot(w_ref[...], xT, preferred_element_type=jnp.float32)    # (d_hidden, tile_m)
    y = y + b_ref[...]                                                  # (d_hidden, 1) bcast
    y = jnp.where(y > 0, y, 0.01 * y)                                   # LeakyReLU(0.01); Dropout = id (eval)
    out_ref[0:d_hidden, :] = y.astype(out_ref.dtype)                    # node_state^T ; feat^T

    # Class readout (stand-in) + log_softmax over the class axis (axis 0 here).
    ns = y[0:q_dim, :]                                                  # node_state^T (q_dim, tile_m)
    logits = jnp.dot(proto_ref[...], ns, preferred_element_type=jnp.float32)  # (nclass, tile_m)
    m = jnp.max(logits, axis=0, keepdims=True)
    z = logits - m
    lse = jnp.log(jnp.sum(jnp.exp(z), axis=0, keepdims=True))
    out_ref[d_hidden:d_hidden + nclass, :] = (z - lse).astype(out_ref.dtype)


def n2_fused_forward(params, x, *, max_tile_m=None, out_dtype=jnp.float32,
                     vmem_limit_bytes=40 * 1024 * 1024):
    """Fused N2 front-end.

    x: (B, N, d_in).  Returns (out_T, meta) where out_T has shape
    (q_dim + d_model + nclass, M_pad), M_pad = B*N rounded up to the row tile:
        rows [0, q_dim)                -> node_state^T
        rows [q_dim, q_dim + d_model)  -> feat^T
        rows [q_dim + d_model, d_out)  -> log_probs^T  (single-class readout)
    Only columns [0, B*N) are valid; padded columns must be masked/sliced by the
    consumer (see unpack_n2_outputs)."""
    B, N, d_in = x.shape
    q_dim = params["nsi_w"].shape[1]
    d_model = params["ff_w"].shape[1]

    # TODO(synk): NodePseudoSubsystem / PathIntegral are not defined in the reference
    # source; as a stand-in "class logits" we project node_state onto the mean
    # class_neuron prototype (readout semantics approximated).
    class_proto = jnp.mean(params["class_neuron"], axis=0)              # (nclass, q_dim)
    nclass = class_proto.shape[0]
    d_hidden = q_dim + d_model
    d_out = d_hidden + nclass

    M = B * N
    if max_tile_m is None:
        max_tile_m = _default_max_tile_m()
    tile_m = min(max_tile_m, _round_up(M, 128))
    tile_m = max(128, (tile_m // 128) * 128)                            # lane-dense multiple of 128
    M_pad = _round_up(M, tile_m)

    x2 = x.reshape(M, d_in).astype(jnp.float32)
    if M_pad != M:
        x2 = jnp.pad(x2, ((0, M_pad - M), (0, 0)))                      # zero rows, masked downstream
    xT = x2.T                                                           # (d_in, M_pad); see TODO above

    # Concatenated weights/biases -> one matmul in-kernel.
    w_cat = jnp.concatenate([params["nsi_w"].T, params["ff_w"].T], axis=0)        # (d_hidden, d_in)
    b_cat = jnp.concatenate([params["nsi_b"], params["ff_b"]]).reshape(d_hidden, 1)

    grid = (M_pad // tile_m,)
    out_itemsize = jnp.dtype(out_dtype).itemsize
    cost = pl.CostEstimate(
        flops=2 * M_pad * d_in * d_hidden + 2 * M_pad * q_dim * nclass,
        transcendentals=M_pad * (nclass + 1),
        bytes_accessed=(4 * M_pad * d_in + out_itemsize * M_pad * d_out
                        + 4 * (d_hidden * d_in + d_hidden + nclass * q_dim)),
    )

    kernel = functools.partial(_n2_fused_kernel,
                               d_hidden=d_hidden, q_dim=q_dim, nclass=nclass)

    out_T = pl.pallas_call(
        kernel,
        out_shape=jax.ShapeDtypeStruct((d_out, M_pad), out_dtype),
        grid_spec=pltpu.PrefetchScalarGridSpec(
            num_scalar_prefetch=0,
            grid=grid,
            in_specs=[
                pl.BlockSpec((d_in, tile_m), lambda i: (0, i)),         # x^T tile (pipelined)
                pl.BlockSpec((d_hidden, d_in), lambda i: (0, 0)),       # [W_nsi^T ; W_ff^T] (resident)
                pl.BlockSpec((d_hidden, 1), lambda i: (0, 0)),          # [b_nsi ; b_ff]
                pl.BlockSpec((nclass, q_dim), lambda i: (0, 0)),        # class prototype
            ],
            out_specs=pl.BlockSpec((d_out, tile_m), lambda i: (0, i)),  # ONE fused lane-dense output
        ),
        compiler_params=pltpu.CompilerParams(
            dimension_semantics=("parallel",),
            vmem_limit_bytes=vmem_limit_bytes,
        ),
        cost_estimate=cost,
    )(xT, w_cat, b_cat, class_proto)

    meta = dict(M=M, B=B, N=N, q_dim=q_dim, d_model=d_model, nclass=nclass)
    return out_T, meta


def unpack_n2_outputs(out_T, meta):
    """Layout plumbing for consumers that need torch-style (B, N, .) arrays.
    This re-reads/transposes the outputs in XLA -- keep it off the hot path."""
    M, B, N = meta["M"], meta["B"], meta["N"]
    q_dim, d_model, nclass = meta["q_dim"], meta["d_model"], meta["nclass"]
    node_state = out_T[:q_dim, :M].T.reshape(B, N, q_dim)
    feat = out_T[q_dim:q_dim + d_model, :M].T.reshape(B, N, d_model)
    log_probs = out_T[q_dim + d_model:q_dim + d_model + nclass, :M].T.reshape(B, N, nclass)
    return node_state, feat, log_probs


def n2_forward(params, x, **kwargs):
    """Torch-layout convenience wrapper (used for the in-file correctness check)."""
    out_T, meta = n2_fused_forward(params, x, **kwargs)
    return unpack_n2_outputs(out_T, meta)


# ---------------------------------------------------------------------------
# N2 parameters (shapes matching N2.__init__)
# ---------------------------------------------------------------------------
def init_n2_params(key, *, d_in, q_dim, d_model, n_pnode, n_c, nclass):
    ks = jax.random.split(key, 6)
    scale = 1.0 / jnp.sqrt(d_in)
    return {
        # node_state_interface: Linear(d_in, q_dim)
        "nsi_w": jax.random.uniform(ks[0], (d_in, q_dim), jnp.float32, -scale, scale),
        "nsi_b": jax.random.uniform(ks[1], (q_dim,), jnp.float32, -scale, scale),
        # feat_ff: Linear(d_in, d_model)
        "ff_w": jax.random.uniform(ks[2], (d_in, d_model), jnp.float32, -scale, scale),
        "ff_b": jax.random.uniform(ks[3], (d_model,), jnp.float32, -scale, scale),
        # pnode_state: (1, n_pnode, q_dim) ~ randn
        "pnode_state": jax.random.normal(ks[4], (1, n_pnode, q_dim), jnp.float32),
        # class_neuron: (n_c, nclass, q_dim) ~ randn
        "class_neuron": jax.random.normal(ks[5], (n_c, nclass, q_dim), jnp.float32),
    }


if __name__ == "__main__":
    # Small shapes consistent with the module's constructor
    B, N = 2, 8          # batch of graphs, dense node count per graph
    d_in = 4             # d_in + d_ein
    q_dim = 32
    d_model = 32
    n_pnode = 16
    n_c = 2
    nclass = 4

    key = jax.random.PRNGKey(0)
    k_param, k_x = jax.random.split(key)
    params = init_n2_params(
        k_param, d_in=d_in, q_dim=q_dim, d_model=d_model,
        n_pnode=n_pnode, n_c=n_c, nclass=nclass)
    x = jax.random.normal(k_x, (B, N, d_in), jnp.float32)

    node_state, feat, log_probs = n2_forward(params, x)
    jax.block_until_ready((node_state, feat, log_probs))

    # Pure-JAX reference check
    def ref_lin(xx, w, b):
        y = xx @ w + b
        return jnp.where(y > 0, y, 0.01 * y)

    ns_ref = ref_lin(x, params["nsi_w"], params["nsi_b"])
    ff_ref = ref_lin(x, params["ff_w"], params["ff_b"])
    logits_ref = jnp.einsum("bnq,cq->bnc", ns_ref,
                            jnp.mean(params["class_neuron"], axis=0))
    lp_ref = jax.nn.log_softmax(logits_ref, axis=-1)

    assert node_state.shape == (B, N, q_dim)
    assert feat.shape == (B, N, d_model)
    assert log_probs.shape == (B, N, nclass)
    assert jnp.allclose(node_state, ns_ref, atol=2e-5), "node_state mismatch"
    assert jnp.allclose(feat, ff_ref, atol=2e-5), "feat mismatch"
    assert jnp.allclose(log_probs, lp_ref, atol=2e-5), "log_softmax mismatch"

    print("KERNEL_OK")
</pallas_src>

<mosaic_0001>
module attributes {stable_mosaic.version = 11 : i64} {
  func.func @_n2_fused_kernel(%arg0: i32, %arg1: memref<4x128xf32, #tpu.memory_space<vmem>>, %arg2: memref<64x4xf32, #tpu.memory_space<vmem>>, %arg3: memref<64x1xf32, #tpu.memory_space<vmem>>, %arg4: memref<4x32xf32, #tpu.memory_space<vmem>>, %arg5: memref<68x128xf32, #tpu.memory_space<vmem>>) attributes {dimension_semantics = [#tpu.dimension_semantics<parallel>], iteration_bounds = array<i64: 1>, scalar_prefetch = 0 : i64, scratch_operands = 0 : i64, tpu.core_type = #tpu.core_type<tc>, window_params = [{transform_indices = @transform_0, window_bounds = array<i64: 4, 128>}, {pipeline_mode = #tpu.pipeline_mode<synchronous>, transform_indices = @transform_1, window_bounds = array<i64: 64, 4>}, {pipeline_mode = #tpu.pipeline_mode<synchronous>, transform_indices = @transform_2, window_bounds = array<i64: 64, 1>}, {pipeline_mode = #tpu.pipeline_mode<synchronous>, transform_indices = @transform_3, window_bounds = array<i64: 4, 32>}, {transform_indices = @transform_4, window_bounds = array<i64: 68, 128>}]} {
    %c0 = arith.constant 0 : index
    %c0_0 = arith.constant 0 : index
    %0 = vector.load %arg1[%c0, %c0_0] : memref<4x128xf32, #tpu.memory_space<vmem>>, vector<4x128xf32>
    %c0_1 = arith.constant 0 : index
    %c0_2 = arith.constant 0 : index
    %1 = vector.load %arg2[%c0_1, %c0_2] : memref<64x4xf32, #tpu.memory_space<vmem>>, vector<64x4xf32>
    %cst = arith.constant dense<0.000000e+00> : vector<64x128xf32>
    %2 = tpu.matmul %1, %0, %cst {dimension_numbers = #tpu.dot_dimension_numbers<[1], [0], [0], [1], [0, 0, 1, 1], [], []>} : vector<64x4xf32>, vector<4x128xf32>, vector<64x128xf32> -> vector<64x128xf32>
    %c0_3 = arith.constant 0 : index
    %c0_4 = arith.constant 0 : index
    %3 = vector.load %arg3[%c0_3, %c0_4] : memref<64x1xf32, #tpu.memory_space<vmem>>, vector<64x1xf32>
    %4 = vector.broadcast %3 : vector<64x1xf32> to vector<64x128xf32>
    %5 = arith.addf %2, %4 : vector<64x128xf32>
    %cst_5 = arith.constant 0.000000e+00 : f32
    %6 = vector.broadcast %cst_5 : f32 to vector<64x128xf32>
    %7 = arith.cmpf ogt, %5, %6 : vector<64x128xf32>
    %cst_6 = arith.constant 0.00999999977 : f32
    %8 = vector.broadcast %cst_6 : f32 to vector<64x128xf32>
    %9 = arith.mulf %8, %5 : vector<64x128xf32>
    %10 = arith.select %7, %5, %9 : vector<64x128xi1>, vector<64x128xf32>
    %c0_7 = arith.constant 0 : index
    %c0_8 = arith.constant 0 : index
    %11 = vector.load %arg5[%c0_7, %c0_8] : memref<68x128xf32, #tpu.memory_space<vmem>>, vector<64x128xf32>
    tpu.vector_store %arg5[%c0_7, %c0_8], %10 {strides = array<i32>} : memref<68x128xf32, #tpu.memory_space<vmem>>, vector<64x128xf32>,
    %12 = vector.extract_strided_slice %10 {offsets = [0, 0], sizes = [32, 128], strides = [1, 1]} : vector<64x128xf32> to vector<32x128xf32>
    %c0_9 = arith.constant 0 : index
    %c0_10 = arith.constant 0 : index
    %13 = vector.load %arg4[%c0_9, %c0_10] : memref<4x32xf32, #tpu.memory_space<vmem>>, vector<4x32xf32>
    %cst_11 = arith.constant dense<0.000000e+00> : vector<4x128xf32>
    %14 = tpu.matmul %13, %12, %cst_11 {dimension_numbers = #tpu.dot_dimension_numbers<[1], [0], [0], [1], [0, 0, 1, 1], [], []>} : vector<4x32xf32>, vector<32x128xf32>, vector<4x128xf32> -> vector<4x128xf32>
    %cst_12 = arith.constant dense<0xFF800000> : vector<128xf32>
    %15 = vector.multi_reduction <maximumf>, %14, %cst_12 [0] : vector<4x128xf32> to vector<128xf32>
    %16 = vector.shape_cast %15 : vector<128xf32> to vector<1x128xf32>
    %17 = vector.broadcast %16 : vector<1x128xf32> to vector<4x128xf32>
    %18 = arith.subf %14, %17 : vector<4x128xf32>
    %19 = math.exp %18 : vector<4x128xf32>
    %cst_13 = arith.constant dense<0.000000e+00> : vector<128xf32>
    %20 = vector.multi_reduction <add>, %19, %cst_13 [0] : vector<4x128xf32> to vector<128xf32>
    %21 = vector.shape_cast %20 : vector<128xf32> to vector<1x128xf32>
    %22 = math.log %21 : vector<1x128xf32>
    %23 = vector.broadcast %22 : vector<1x128xf32> to vector<4x128xf32>
    %24 = arith.subf %18, %23 : vector<4x128xf32>
    %c64 = arith.constant 64 : index
    %c0_14 = arith.constant 0 : index
    %25 = vector.load %arg5[%c64, %c0_14] : memref<68x128xf32, #tpu.memory_space<vmem>>, vector<4x128xf32>
    tpu.vector_store %arg5[%c64, %c0_14], %24 {strides = array<i32>} : memref<68x128xf32, #tpu.memory_space<vmem>>, vector<4x128xf32>,
    return
  }
  func.func @transform_0(%arg0: i32) -> (i32, i32) {
    %c0_i32 = arith.constant 0 : i32
    %c0_i32_0 = arith.constant 0 : i32
    return %c0_i32, %arg0 : i32, i32
  }
  func.func @transform_1(%arg0: i32) -> (i32, i32) {
    %c0_i32 = arith.constant 0 : i32
    %c0_i32_0 = arith.constant 0 : i32
    %c0_i32_1 = arith.constant 0 : i32
    return %c0_i32, %c0_i32_0 : i32, i32
  }
  func.func @transform_2(%arg0: i32) -> (i32, i32) {
    %c0_i32 = arith.constant 0 : i32
    %c0_i32_0 = arith.constant 0 : i32
    %c0_i32_1 = arith.constant 0 : i32
    return %c0_i32, %c0_i32_0 : i32, i32
  }
  func.func @transform_3(%arg0: i32) -> (i32, i32) {
    %c0_i32 = arith.constant 0 : i32
    %c0_i32_0 = arith.constant 0 : i32
    %c0_i32_1 = arith.constant 0 : i32
    return %c0_i32, %c0_i32_0 : i32, i32
  }
  func.func @transform_4(%arg0: i32) -> (i32, i32) {
    %c0_i32 = arith.constant 0 : i32
    %c0_i32_0 = arith.constant 0 : i32
    return %c0_i32, %arg0 : i32, i32
  }
}

</mosaic_0001>

<bundles_post_ra>
// kernel: tpu_custom_call.1
= control target key start
LH: loop header
LB: loop body
LE: loop exit
PB: predicated region body
PF: predicated region fallthrough
CT: control target
= control target key end

     0   :  { %vm100_vm0 = vcmask 1043456   ;;  %vm75_vm1 = vcmask 31744   ;;  %v436_v4 = vmov 0   ;;  %s536_s0 = inlined_call_operand.vmem [shape: f32[4,128], index: 0, kind: input, shape index: {}]   ;;  %s537_s1 = inlined_call_operand.vmem [shape: f32[64,4], index: 1, kind: input, shape index: {}]   ;;  %s538_s2 = inlined_call_operand.vmem [shape: f32[64,1], index: 2, kind: input, shape index: {}]   ;;  %s539_s3 = inlined_call_operand.vmem [shape: f32[4,32], index: 3, kind: input, shape index: {}]   ;;  %s540_s4 = inlined_call_operand.hbm [shape: f32[68,128], index: 4, kind: output, shape index: {}]  }
   0x1   :  { %v18_v0 = vld [vmem:[%s536_s0] sm:$0xf]  ;;  %v20_v2 = vld [vmem:[%s537_s1 + $0x8] sm:$0xff]  ;;  %v21_v3 = vld [vmem:[%s537_s1 + $0x10] sm:$0xff]  ;;  %408 = vset.pattern.permute.xlu0 %v436_v4  ;;  %409 = vset.pattern.permute.xlu1 %v436_v4 }
   0x2   :  { %v19_v1 = vld [vmem:[%s537_s1] sm:$0xff]  ;;  %377 = vmatprep.subr.msk.mxu0 %vm100_vm0, %v18_v0  ;;  %v30_v5 = vld [vmem:[%s538_s2 + $0x18] sm:$0xff]  ;;  %v28_v6 = vld [vmem:[%s538_s2 + $0x8] sm:$0xff] }
   0x3   :  { %379 = vmatprep.mubr.msk.f32.mxu0 %vm75_vm1, %v19_v1  ;;  %378 = vmatpush3.msk.msra.mxu0 %vm100_vm0, %v18_v0  ;;  %v22_v7 = vld [vmem:[%s537_s1 + $0x18] sm:$0xff]  ;;  %v23_v8 = vld [vmem:[%s537_s1 + $0x20] sm:$0xff]  ;;  %v29_v9 = vld [vmem:[%s538_s2 + $0x10] sm:$0xff] }
   0x4   :  { %380 = vmatmul.mubr.msk.f32.vlgmr.msra.gmra.mxu0 %vm75_vm1, %v20_v2  ;;  %52 = vperm.xlu0 %408, %v30_v5  }
   0x5   :  { %382 = vmatprep.mubr.msk.f32.mxu0 %vm75_vm1, %v21_v3  ;;  %42 = vperm.xlu1 %409, %v28_v6  }
   0x6   :  { %9 = vsyncpa [#allocation3], 0  ;;  %v27_v10 = vld [vmem:[%s538_s2] sm:$0xff]  ;;  %v24_v11 = vld [vmem:[%s537_s1 + $0x28] sm:$0xff]  ;;  %v437_v18 = vmov 0.0   ;;  %vm438_vm2 = vmmov 0  }
   0x7   :  { %v25_v12 = vld [vmem:[%s537_s1 + $0x30] sm:$0xff]  ;;  %v31_v13 = vld [vmem:[%s538_s2 + $0x20] sm:$0xff]  ;;  %v32_v14 = vld [vmem:[%s538_s2 + $0x28] sm:$0xff]  ;;  %391 = vmatprep.subr.mxu1 %v437_v18  ;;  %399 = vmatprep.mubr.msk.f32.mxu1 %vm438_vm2, %v437_v18  ;;  %vm242_vm9 = vcmask 261120  }
   0x8   :  { %383 = vmatmul.mubr.msk.f32.gmra.mxu0 %vm75_vm1, %v22_v7  ;;  %47 = vperm.xlu0 %408, %v29_v9   ;;  %v26_v15 = vld [vmem:[%s537_s1 + $0x38] sm:$0xff]  ;;  %v33_v16 = vld [vmem:[%s538_s2 + $0x30] sm:$0xff]  ;;  %v241_v53 = vld [vmem:[%s539_s3] sm:$0xf]  ;;  %s439_s3 = smov [#allocation2]  }
   0x9   :  { %385 = vmatprep.mubr.msk.f32.mxu0 %vm75_vm1, %v23_v8  ;;  %37 = vperm.xlu1 %409, %v27_v10   ;;  %v34_v17 = vld [vmem:[%s538_s2 + $0x38] sm:$0xff]  ;;  %s342_s22 = sshll.u32 %s439_s3, 4  ;;  %s343_s22 = int_to_ptr.vmem [resolvable:$true] %s342_s22 }
   0xa   :  { %s414_s0 = scalar_lea.vmem %s343_s22, 1152  ;;  %p419_p1 = scmp.lt.s32.totalorder %s343_s22, %s343_s22 }
   0xb   :  { %p415_p0 = scmp.ne.s32.totalorder %s343_s22, %s414_s0  ;;  %p420_p2 = scmp.lt.s32.totalorder %s414_s0, %s414_s0 }
   0xc   :  { %386 = vmatmul.mubr.msk.f32.gmra.mxu0 %vm75_vm1, %v24_v11  ;;  %57 = vperm.xlu0 %408, %v31_v13  }
   0xd   :  { %388 = vmatprep.mubr.msk.f32.mxu0 %vm75_vm1, %v25_v12  ;;  %62 = vperm.xlu1 %409, %v32_v14   ;;  %p421_p3 = por %p420_p2, %p419_p1 }
   0xf   :  { %p422_p4 = pnand %p421_p3, %p415_p0 }
  0x10   :  { %389 = vmatmul.mubr.msk.f32.gmra.mxu0 %vm75_vm1, %v26_v15  ;;  %67 = vperm.xlu0 %408, %v33_v16  }
  0x11   :  { %72 = vperm.xlu1 %409, %v34_v17  }
  0x7f   :  { %v53_v20 = vpop.permute.xlu0 %52 }
  0x80   :  { %v43_v19 = vpop.permute.xlu1 %42 }
  0x83   :  { %v48_v24 = vpop.permute.xlu0 %47 }
  0x84   :  { %v38_v21 = vpop.permute.xlu1 %37 }
  0x87   :  { %v58_v37 = vpop.permute.xlu0 %57 }
  0x88   :  { %v63_v32 = vpop.permute.xlu1 %62 }
  0x8b   :  { %v68_v51 = vpop.permute.xlu0 %67 }
  0x8c   :  { %v73_v46 = vpop.permute.xlu1 %72 }
  0xc4   :  { %v381_v22 = vpop.f32.mrf.mxu0 }
  0xc5   :  { %v176_v23 = vadd.f32 %v381_v22, %v43_v19 }
  0xc6   :  { %v170_v25 = vpop.f32.mrf.mxu0 }
  0xc7   :  { %v218_v26 = vmul.f32 0.01, %v176_v23  ;;  %v171_v27 = vadd.f32 %v170_v25, %v38_v21  ;;  %vm210_vm3 = vcmp.gt.f32.partialorder %v176_v23, 0.0 }
  0xc8   :  { %v384_v28 = vpop.f32.mrf.mxu0 }
  0xc9   :  { %v217_v29 = vmul.f32 0.01, %v171_v27  ;;  %v186_v30 = vadd.f32 %v384_v28, %v53_v20  ;;  %v226_v31 = vsel %vm210_vm3, %v176_v23, %v218_v26  ;;  %vm209_vm4 = vcmp.gt.f32.partialorder %v171_v27, 0.0 }
  0xca   :  { %v180_v33 = vpop.f32.mrf.mxu0  ;;  %234 = vst [vmem:[#allocation2 + $0x8] sm:$0xff] %v226_v31 }
  0xcb   :  { %v181_v34 = vadd.f32 %v180_v33, %v48_v24  ;;  %vm212_vm5 = vcmp.gt.f32.partialorder %v186_v30, 0.0  ;;  %v220_v35 = vmul.f32 0.01, %v186_v30  ;;  %v225_v36 = vsel %vm209_vm4, %v171_v27, %v217_v29 }
  0xcc   :  { %v387_v38 = vpop.f32.mrf.mxu0  ;;  %233 = vst [vmem:[#allocation2] sm:$0xff] %v225_v36 }
  0xcd   :  { %v219_v39 = vmul.f32 0.01, %v181_v34  ;;  %v196_v40 = vadd.f32 %v387_v38, %v63_v32  ;;  %v228_v41 = vsel %vm212_vm5, %v186_v30, %v220_v35  ;;  %vm211_vm6 = vcmp.gt.f32.partialorder %v181_v34, 0.0 }
  0xce   :  { %v190_v42 = vpop.f32.mrf.mxu0  ;;  %236 = vst [vmem:[#allocation2 + $0x18] sm:$0xff] %v228_v41  ;;  %392 = vmatpush3.msra.mxu1 %v228_v41 }
  0xcf   :  { %vm214_vm7 = vcmp.gt.f32.partialorder %v196_v40, 0.0  ;;  %v222_v43 = vmul.f32 0.01, %v196_v40  ;;  %v191_v44 = vadd.f32 %v190_v42, %v58_v37  ;;  %393 = vmatprep.subr.mxu1 %v437_v18  ;;  %v227_v45 = vsel %vm211_vm6, %v181_v34, %v219_v39 }
  0xd0   :  { %v390_v47 = vpop.f32.mrf.mxu0  ;;  %235 = vst [vmem:[#allocation2 + $0x10] sm:$0xff] %v227_v45  ;;  %394 = vmatpush3.msra.mxu1 %v227_v45 }
  0xd1   :  { %v230_v48 = vsel %vm214_vm7, %v196_v40, %v222_v43  ;;  %vm213_vm8 = vcmp.gt.f32.partialorder %v191_v44, 0.0  ;;  %v221_v49 = vmul.f32 0.01, %v191_v44  ;;  %v206_v50 = vadd.f32 %v390_v47, %v73_v46  ;;  %395 = vmatprep.subr.mxu1 %v437_v18 }
  0xd2   :  { %238 = vst [vmem:[#allocation2 + $0x28] sm:$0xff] %v230_v48  ;;  %v200_v52 = vpop.f32.mrf.mxu0  ;;  %396 = vmatpush3.msra.mxu1 %v226_v31 }
  0xd3   :  { %v229_v54 = vsel %vm213_vm8, %v191_v44, %v221_v49  ;;  %vm216_vm10 = vcmp.gt.f32.partialorder %v206_v50, 0.0  ;;  %v224_v55 = vmul.f32 0.01, %v206_v50  ;;  %v201_v56 = vadd.f32 %v200_v52, %v68_v51  ;;  %397 = vmatprep.subr.mxu1 %v437_v18 }
  0xd4   :  { %237 = vst [vmem:[#allocation2 + $0x20] sm:$0xff] %v229_v54  ;;  %398 = vmatpush3.msra.mxu1 %v225_v36 }
  0xd5   :  { %v232_v57 = vsel %vm216_vm10, %v206_v50, %v224_v55  ;;  %vm215_vm11 = vcmp.gt.f32.partialorder %v201_v56, 0.0  ;;  %v223_v58 = vmul.f32 0.01, %v201_v56  ;;  %400 = vmatmul.mubr.msk.f32.vlgmr.msra.gmra.mxu1 %vm242_vm9, %v241_v53 }
  0xd6   :  { %240 = vst [vmem:[#allocation2 + $0x38] sm:$0xff] %v232_v57 }
  0xd7   :  { %v231_v59 = vsel %vm215_vm11, %v201_v56, %v223_v58 }
  0xd8   :  { %239 = vst [vmem:[#allocation2 + $0x30] sm:$0xff] %v231_v59 }
 0x195   :  { %v312_v60 = vpop.f32.mrf.mxu1 }
 0x196   :  { %v316_v61 = vsel %vm100_vm0, %v312_v60, -inf }
 0x197   :  { %v317_v62 = vrot.slane %v316_v61, 4  ;;  %v401_v63 = vpop.f32.mrf.mxu1 }
 0x199   :  { %v318_v0 = vmax.f32 %v316_v61, %v317_v62 }
 0x19b   :  { %v319_v1 = vrot.slane %v318_v0, 2 }
 0x19d   :  { %v320_v2 = vmax.f32 %v318_v0, %v319_v1 }
 0x19f   :  { %v321_v3 = vrot.slane %v320_v2, 1 }
 0x1a1   :  { %v322_v4 = vmax.f32 %v320_v2, %v321_v3 }
 0x1a3   :  { %v323_v5 = vsub.f32 %v312_v60, %v322_v4 }
 0x1a5   :  { %v324_v6 = vmul.f32 1.442695, %v323_v5 }
 0x1a7   :  { %410 = vpow2.f32 %v324_v6 }
 0x1b4   :  { %v411_v7 = vpop.eup %410 }
 0x1b5   :  { %v326_v8 = vsel %vm100_vm0, %v411_v7, 0.0 }
 0x1b6   :  { %v327_v9 = vrot.slane %v326_v8, 4 }
 0x1b8   :  { %v328_v10 = vadd.f32 %v327_v9, %v326_v8 }
 0x1ba   :  { %v329_v11 = vrot.slane %v328_v10, 2 }
 0x1bc   :  { %v330_v12 = vadd.f32 %v329_v11, %v328_v10 }
 0x1be   :  { %v331_v13 = vrot.slane %v330_v12, 1 }
 0x1c0   :  { %v332_v14 = vadd.f32 %v331_v13, %v330_v12 }
 0x1c2   :  { %412 = vlog2.f32 %v332_v14 }
 0x1cf   :  { %v413_v15 = vpop.eup %412 }
 0x1d0   :  { %v334_v16 = vmul.f32 0.6931472, %v413_v15 }
 0x1d2   :  { %v335_v17 = vsub.f32 %v323_v5, %v334_v16 }
 0x1d4   :  { %336 = vst [vmem:[#allocation2 + $0x40] sm:$0xf] %v335_v17 }
 0x1d5   :  { %425 = shalt.err (!%p422_p4)
}
 0x1d6   :  { %s440_s23 = smov 128   ;;  %s441_s24 = smov 8  }
 0x1d7   :  { %348 = dma.vmem_to_hbm [thread:$0]  %s343_s22, 1152, %s540_s4, [#allocation3], %s440_s23, %s440_s23, %s441_s24  }
 0x1d8   :  { %434 = dma.done.wait [#allocation3], 1152  }
 0x1d9   :  { %435 = vsyncadd [#allocation3], 4294966144 }
 0x1da   :  { %352 = vsyncpa [#allocation3], 1 }

</bundles_post_ra>
